<compile_context>
chip_gen: v6e
topology: v6e:2x2x1
jax: 0.10.0
libtpu: 0.0.40
codegen_flags: <defaults>
</compile_context>

<pallas_src>
import jax
import jax.numpy as jnp
from jax.experimental import pallas as pl
from jax.experimental.pallas import tpu as pltpu
from math import sqrt


def _silu(v):
    # f32 elementwise; sigmoid/exp lower to the EUP slot (separate from VALU).
    return v * jax.nn.sigmoid(v)


def residual_layer_kernel(x_ref, w1_ref, b1_ref, w2_ref, b2_ref, out_ref):
    x = x_ref[...]                                       # f32 [tm, Hp]
    xb = x.astype(w1_ref.dtype)                          # bf16 only for the MXU
    h = jnp.dot(xb, w1_ref[...], preferred_element_type=jnp.float32)
    h = _silu(h + b1_ref[...])                           # f32 bias + SiLU
    h = jnp.dot(h.astype(w2_ref.dtype), w2_ref[...],
                preferred_element_type=jnp.float32)
    h = _silu(h + b2_ref[...])
    # Residual uses the full-precision x; only the final store narrows.
    out_ref[...] = (x + h).astype(out_ref.dtype)


def _round_up(v, m):
    return ((v + m - 1) // m) * m


def prepare_params(params, *, compute_dtype=jnp.bfloat16):
    """One-time (init-time) cast / pad of the layer parameters.

    w1/w2: [H, H] f32 -> [Hp, Hp] compute_dtype   (Hp = H rounded up to 128)
    b1/b2: [H]    f32 -> [1, Hp]  f32
    For the DimeNet++ default H=128 this is a pure cast (no padding).
    """
    H = params["w1"].shape[0]
    Hp = _round_up(H, 128)

    def pad_w(w):
        w = w.astype(compute_dtype)
        if Hp != H:
            w = jnp.zeros((Hp, Hp), compute_dtype).at[:H, :H].set(w)
        return w

    def pad_b(b):
        b = b.reshape(1, H).astype(jnp.float32)
        if Hp != H:
            b = jnp.zeros((1, Hp), jnp.float32).at[:, :H].set(b)
        return b

    return {"w1": pad_w(params["w1"]), "b1": pad_b(params["b1"]),
            "w2": pad_w(params["w2"]), "b2": pad_b(params["b2"]),
            "hidden": H}


def residual_layer_forward(x, prepared, *, tile_m=256, out_dtype=jnp.bfloat16):
    """x: f32 [M, H]; prepared: output of prepare_params().

    Semantics match the PyTorch module:
        out = x + silu(silu(x @ W1 + b1) @ W2 + b2)
    """
    M, H = x.shape
    assert prepared["hidden"] == H
    w1, b1 = prepared["w1"], prepared["b1"]
    w2, b2 = prepared["w2"], prepared["b2"]
    Hp = w1.shape[0]

    # Fallback path only (H not a multiple of 128): pad the feature axis.
    x_in = x if Hp == H else jnp.zeros((M, Hp), x.dtype).at[:, :H].set(x)

    # Row tile: multiple of 8 sublanes; ragged M -> masked partial last block.
    tm = min(tile_m, _round_up(M, 8))
    grid = (pl.cdiv(M, tm),)

    row_spec = pl.BlockSpec((tm, Hp), lambda m: (m, 0))
    # Constant index_map -> single buffer (no point double-buffering weights).
    const = lambda shape: pl.BlockSpec(shape, lambda m: (0, 0),
                                       pipeline_mode=pl.Buffered(1))

    bytes_accessed = (M * Hp * x_in.dtype.itemsize            # x read
                      + 2 * Hp * Hp * w1.dtype.itemsize       # W1 + W2
                      + 2 * Hp * 4                            # b1 + b2
                      + M * Hp * jnp.dtype(out_dtype).itemsize)  # out write
    cost = pl.CostEstimate(flops=4 * M * Hp * Hp,
                           transcendentals=2 * M * Hp,
                           bytes_accessed=int(bytes_accessed))

    out = pl.pallas_call(
        residual_layer_kernel,
        out_shape=jax.ShapeDtypeStruct((M, Hp), out_dtype),
        grid_spec=pltpu.PrefetchScalarGridSpec(
            num_scalar_prefetch=0,
            grid=grid,
            in_specs=[
                row_spec,            # x tile  [tm, Hp]  f32
                const((Hp, Hp)),     # W1      bf16 (single-buffered)
                const((1, Hp)),      # b1      f32
                const((Hp, Hp)),     # W2      bf16
                const((1, Hp)),      # b2      f32
            ],
            out_specs=row_spec,      # out tile [tm, Hp] bf16
        ),
        compiler_params=pltpu.CompilerParams(
            # Rows are independent -> shard across TensorCores on v7x.
            dimension_semantics=("parallel",)),
        cost_estimate=cost,
    )(x_in, w1, b1, w2, b2)

    return out if Hp == H else out[:, :H]


def init_params(key, hidden_channels):
    """Synthetic init mirroring the PyTorch shapes (bias = 0 per reset_parameters)."""
    # TODO(synk): glorot_orthogonal init not reproduced (init-only; forward unchanged).
    H = hidden_channels
    k1, k2 = jax.random.split(key, 2)
    scale = sqrt(2.0 / (H + H))
    return {
        "w1": scale * jax.random.normal(k1, (H, H), jnp.float32),
        "b1": jnp.zeros((H,), jnp.float32),
        "w2": scale * jax.random.normal(k2, (H, H), jnp.float32),
        "b2": jnp.zeros((H,), jnp.float32),
    }


def reference_forward(x, params):
    """Pure-JAX f32 reference matching the PyTorch semantics."""
    h = jax.nn.silu(x @ params["w1"] + params["b1"][None, :])
    h = jax.nn.silu(h @ params["w2"] + params["b2"][None, :])
    return x + h


if __name__ == "__main__":
    hidden_channels = 128   # DimeNet++ default; lane-dense (no padding path)
    num_rows = 1000         # ragged vs tile_m=256 -> 4 grid steps, last masked

    key = jax.random.PRNGKey(0)
    kp, kx = jax.random.split(key, 2)

    params = init_params(kp, hidden_channels)
    prepared = prepare_params(params)          # one-time weight cast (hoisted)
    x = jax.random.normal(kx, (num_rows, hidden_channels), jnp.float32)

    out = residual_layer_forward(x, prepared, tile_m=256)
    out = jax.block_until_ready(out)

    assert out.shape == (num_rows, hidden_channels)
    assert out.dtype == jnp.bfloat16

    # Reference using the same bf16-quantized weights (weight quantization is a
    # deliberate design choice; this isolates kernel numerics: f32 MXU accum,
    # f32 skip path, bf16 output store).
    H = hidden_channels
    q = {"w1": prepared["w1"][:H, :H].astype(jnp.float32),
         "w2": prepared["w2"][:H, :H].astype(jnp.float32),
         "b1": params["b1"], "b2": params["b2"]}
    ref = reference_forward(x, q)
    out_f32 = out.astype(jnp.float32)
    max_err = jnp.max(jnp.abs(out_f32 - ref))
    assert jnp.allclose(out_f32, ref, atol=5e-2, rtol=5e-2), f"mismatch: {max_err}"

    print("KERNEL_OK")
</pallas_src>

<mosaic_0001>
module attributes {stable_mosaic.version = 11 : i64} {
  func.func @residual_layer_kernel(%arg0: i32, %arg1: memref<256x128xf32, #tpu.memory_space<vmem>>, %arg2: memref<128x128xbf16, #tpu.memory_space<vmem>>, %arg3: memref<1x128xf32, #tpu.memory_space<vmem>>, %arg4: memref<128x128xbf16, #tpu.memory_space<vmem>>, %arg5: memref<1x128xf32, #tpu.memory_space<vmem>>, %arg6: memref<256x128xbf16, #tpu.memory_space<vmem>>) attributes {dimension_semantics = [#tpu.dimension_semantics<parallel>], iteration_bounds = array<i64: 4>, scalar_prefetch = 0 : i64, scratch_operands = 0 : i64, tpu.core_type = #tpu.core_type<tc>, window_params = [{transform_indices = @transform_0, window_bounds = array<i64: 256, 128>}, {pipeline_mode = #tpu.pipeline_mode<synchronous>, transform_indices = @transform_1, window_bounds = array<i64: 128, 128>}, {pipeline_mode = #tpu.pipeline_mode<synchronous>, transform_indices = @transform_2, window_bounds = array<i64: 1, 128>}, {pipeline_mode = #tpu.pipeline_mode<synchronous>, transform_indices = @transform_3, window_bounds = array<i64: 128, 128>}, {pipeline_mode = #tpu.pipeline_mode<synchronous>, transform_indices = @transform_4, window_bounds = array<i64: 1, 128>}, {transform_indices = @transform_5, window_bounds = array<i64: 256, 128>}]} {
    %c0 = arith.constant 0 : index
    %c0_0 = arith.constant 0 : index
    %0 = vector.load %arg1[%c0, %c0_0] : memref<256x128xf32, #tpu.memory_space<vmem>>, vector<256x128xf32>
    %1 = arith.truncf %0 : vector<256x128xf32> to vector<256x128xbf16>
    %c0_1 = arith.constant 0 : index
    %c0_2 = arith.constant 0 : index
    %2 = vector.load %arg2[%c0_1, %c0_2] : memref<128x128xbf16, #tpu.memory_space<vmem>>, vector<128x128xbf16>
    %cst = arith.constant dense<0.000000e+00> : vector<256x128xf32>
    %3 = tpu.matmul %1, %2, %cst {dimension_numbers = #tpu.dot_dimension_numbers<[1], [0], [0], [1], [0, 0, 1, 1], [], []>} : vector<256x128xbf16>, vector<128x128xbf16>, vector<256x128xf32> -> vector<256x128xf32>
    %c0_3 = arith.constant 0 : index
    %c0_4 = arith.constant 0 : index
    %4 = vector.load %arg3[%c0_3, %c0_4] : memref<1x128xf32, #tpu.memory_space<vmem>>, vector<1x128xf32>
    %5 = vector.broadcast %4 : vector<1x128xf32> to vector<256x128xf32>
    %6 = arith.addf %3, %5 : vector<256x128xf32>
    %7 = arith.negf %6 : vector<256x128xf32>
    %8 = math.exp %7 : vector<256x128xf32>
    %cst_5 = arith.constant 1.000000e+00 : f32
    %9 = vector.broadcast %cst_5 : f32 to vector<256x128xf32>
    %10 = arith.addf %9, %8 : vector<256x128xf32>
    %11 = arith.divf %9, %10 : vector<256x128xf32>
    %12 = arith.mulf %6, %11 : vector<256x128xf32>
    %13 = arith.truncf %12 : vector<256x128xf32> to vector<256x128xbf16>
    %c0_6 = arith.constant 0 : index
    %c0_7 = arith.constant 0 : index
    %14 = vector.load %arg4[%c0_6, %c0_7] : memref<128x128xbf16, #tpu.memory_space<vmem>>, vector<128x128xbf16>
    %cst_8 = arith.constant dense<0.000000e+00> : vector<256x128xf32>
    %15 = tpu.matmul %13, %14, %cst_8 {dimension_numbers = #tpu.dot_dimension_numbers<[1], [0], [0], [1], [0, 0, 1, 1], [], []>} : vector<256x128xbf16>, vector<128x128xbf16>, vector<256x128xf32> -> vector<256x128xf32>
    %c0_9 = arith.constant 0 : index
    %c0_10 = arith.constant 0 : index
    %16 = vector.load %arg5[%c0_9, %c0_10] : memref<1x128xf32, #tpu.memory_space<vmem>>, vector<1x128xf32>
    %17 = vector.broadcast %16 : vector<1x128xf32> to vector<256x128xf32>
    %18 = arith.addf %15, %17 : vector<256x128xf32>
    %19 = arith.negf %18 : vector<256x128xf32>
    %20 = math.exp %19 : vector<256x128xf32>
    %cst_11 = arith.constant 1.000000e+00 : f32
    %21 = vector.broadcast %cst_11 : f32 to vector<256x128xf32>
    %22 = arith.addf %21, %20 : vector<256x128xf32>
    %23 = arith.divf %21, %22 : vector<256x128xf32>
    %24 = arith.mulf %18, %23 : vector<256x128xf32>
    %25 = arith.addf %0, %24 : vector<256x128xf32>
    %26 = arith.truncf %25 : vector<256x128xf32> to vector<256x128xbf16>
    %c0_12 = arith.constant 0 : index
    %c0_13 = arith.constant 0 : index
    %27 = vector.load %arg6[%c0_12, %c0_13] : memref<256x128xbf16, #tpu.memory_space<vmem>>, vector<256x128xbf16>
    tpu.vector_store %arg6[%c0_12, %c0_13], %26 {strides = array<i32>} : memref<256x128xbf16, #tpu.memory_space<vmem>>, vector<256x128xbf16>,
    return
  }
  func.func @transform_0(%arg0: i32) -> (i32, i32) {
    %c0_i32 = arith.constant 0 : i32
    %c0_i32_0 = arith.constant 0 : i32
    return %arg0, %c0_i32 : i32, i32
  }
  func.func @transform_1(%arg0: i32) -> (i32, i32) {
    %c0_i32 = arith.constant 0 : i32
    %c0_i32_0 = arith.constant 0 : i32
    %c0_i32_1 = arith.constant 0 : i32
    return %c0_i32, %c0_i32_0 : i32, i32
  }
  func.func @transform_2(%arg0: i32) -> (i32, i32) {
    %c0_i32 = arith.constant 0 : i32
    %c0_i32_0 = arith.constant 0 : i32
    %c0_i32_1 = arith.constant 0 : i32
    return %c0_i32, %c0_i32_0 : i32, i32
  }
  func.func @transform_3(%arg0: i32) -> (i32, i32) {
    %c0_i32 = arith.constant 0 : i32
    %c0_i32_0 = arith.constant 0 : i32
    %c0_i32_1 = arith.constant 0 : i32
    return %c0_i32, %c0_i32_0 : i32, i32
  }
  func.func @transform_4(%arg0: i32) -> (i32, i32) {
    %c0_i32 = arith.constant 0 : i32
    %c0_i32_0 = arith.constant 0 : i32
    %c0_i32_1 = arith.constant 0 : i32
    return %c0_i32, %c0_i32_0 : i32, i32
  }
  func.func @transform_5(%arg0: i32) -> (i32, i32) {
    %c0_i32 = arith.constant 0 : i32
    %c0_i32_0 = arith.constant 0 : i32
    return %arg0, %c0_i32 : i32, i32
  }
}

</mosaic_0001>

<bundles_post_ra>
// kernel: tpu_custom_call.1
= control target key start
LH: loop header
LB: loop body
LE: loop exit
PB: predicated region body
PF: predicated region fallthrough
CT: control target
= control target key end

     0   :  { %10 = vsyncpa [#allocation3], 0  ;;  %s3167_s0 = inlined_call_operand.hbm [shape: f32[1000,128], index: 0, kind: input, shape index: {}]   ;;  %s3168_s1 = inlined_call_operand.hbm [shape: bf16[128,128], index: 1, kind: input, shape index: {}]   ;;  %s3169_s2 = inlined_call_operand.vmem [shape: f32[1,128], index: 2, kind: input, shape index: {}]   ;;  %s3170_s3 = inlined_call_operand.hbm [shape: bf16[128,128], index: 3, kind: input, shape index: {}]   ;;  %s3171_s4 = inlined_call_operand.vmem [shape: f32[1,128], index: 4, kind: input, shape index: {}]   ;;  %s3172_s5 = inlined_call_operand.hbm [shape: bf16[1000,128], index: 5, kind: output, shape index: {}]  }
   0x1   :  { %12 = vsyncpa [#allocation3 + $0x1], 0 }
   0x2   :  { %13 = vsyncpa [#allocation6], 0 }
   0x3   :  { %14 = vsyncpa [#allocation4], 0 }
   0x4   :  { %16 = vsyncpa [#allocation4 + $0x1], 0  ;;  %s2540_s18 = smov 0   ;;  %s2542_s19 = smov 0  }
   0x5   :  { %s2544_s20 = smov 0   ;;  %s2546_s21 = smov 0  }
   0x6 LB: > { %s2561_s22 = sadd.s32 4294967295, %s2498_s21   ;;  %s1569_s23 = sadd.s32 4294967294, %s2498_s21   ;;  %s2498_s21 = sphi %s2546_s21, %s3189_s21   ;;  %s2494_s20 = sphi %s2544_s20, %s3188_s20   ;;  %s2490_s19 = sphi %s2542_s19, %s3187_s19   ;;  %s2486_s18 = sphi %s2540_s18, %s3186_s18  }
   0x7   : > { %s2565_s24 = sadd.s32 1, %s2498_s21   ;;  %s29_s25 = sadd.s32 1, %s2494_s20 }
   0x8   : > { %s26_s26 = ssub.s32 %s2498_s21, %s2565_s24  ;;  %p36_p0 = scmp.ne.s32.totalorder %s2494_s20, %s2490_s19 }
   0x9   : > { %p27_p1 = scmp.eq.s32.totalorder %s26_s26, 0  ;;  %p37_p2 = scmp.eq.s32.totalorder %s2498_s21, 0 }
   0xa   : > { %p42_p3 = scmp.ne.s32.totalorder %s2490_s19, %s2486_s18  ;;  %p3173_p4 = scmp.eq.s32.totalorder %s2561_s22, 0 }
   0xb   : > { %s2577_s27 = scalar_select %p27_p1, %s2494_s20, %s29_s25  }
   0xc   : > { %p2579_p5 = por %p37_p2, %p36_p0  ;;  %p2585_p6 = por %p3173_p4, %p42_p3 }
   0xd   : > { %p150_p7 = scmp.eq.s32.totalorder %s2561_s22, 3  ;;  %p156_p8 = scmp.eq.s32.totalorder %s1569_s23, 3 }
   0xe   : > { %s3176_s29 = scalar_select %p2585_p6, 1, 0 }
   0xf   : > { %p1570_p9 = scmp.ge.s32.totalorder %s2498_s21, 1  ;;  %p163_p10 = scmp.lt.s32.totalorder %s2498_s21, 5 }
  0x10   : > { %p2592_p11 = por %p150_p7, %p36_p0  ;;  %p2596_p12 = por %p156_p8, %p42_p3 }
  0x11   : > { %p2600_p13 = pnand %p1570_p9, %p163_p10  ;;  %s2500_s8 = smov [#allocation5]  }
  0x12   : > { %s3177_s30 = scalar_select %p2592_p11, 1, 0 }
  0x13   : > { %s3178_s6 = scalar_select %p2596_p12, 1, 0 }
  0x14   : > { %p1992_p1 = pneg %p2600_p13  ;;  %s175_s9 = sshll.u32 %s2500_s8, 4  ;;  %s176_s9 = int_to_ptr.vmem [resolvable:$true] %s175_s9 }
  0x15   : > { %s2501_s11 = smov [#allocation7]   ;;  %s2363_s13 = scalar_lea.vmem %s176_s9, 1024 }
  0x16   : > { %p2608_p2 = pnand %p1992_p1, %p3173_p4  ;;  %s191_s12 = sshll.u32 %s2501_s11, 4  ;;  %s192_s12 = int_to_ptr.vmem [resolvable:$true] %s191_s12 }
  0x17   : > { %p2364_p3 = scmp.ne.s32.totalorder %s176_s9, %s2363_s13  ;;  %p2371_p9 = scmp.lt.s32.totalorder %s176_s9, %s176_s9 }
  0x18   : > { %p2354_p0 = pneg %p2608_p2  ;;  %p2372_p10 = scmp.lt.s32.totalorder %s2363_s13, %s2363_s13 }
  0x1a   : > { %p2366_p7 = pnand %p2364_p3, %p2354_p0  ;;  %p2373_p12 = por %p2372_p10, %p2371_p9 }
  0x1c   : > { %p2367_p8 = pneg %p2366_p7 }
  0x1e   : > { %p2374_p1 = pnand %p2373_p12, %p2367_p8 }
  0x20   : > { %2377 = shalt.err (!%p2374_p1)
}
  0x21   : > { %s2502_s14 = smov 64   ;;  %s2503_s15 = smov 4  }
  0x22   : > { %1995 = dma.hbm_to_vmem [thread:$0]  (!%p2608_p2), %s3168_s1, 1024, %s176_s9, [#allocation6], %s2502_s14, %s2502_s14, %s2503_s15  }
  0x23   : > { %s2389_s23 = scalar_lea.vmem %s192_s12, 1024  ;;  %p2397_p11 = scmp.lt.s32.totalorder %s192_s12, %s192_s12 }
  0x24   : > { %p2390_p4 = scmp.ne.s32.totalorder %s192_s12, %s2389_s23  ;;  %p2398_p6 = scmp.lt.s32.totalorder %s2389_s23, %s2389_s23 }
  0x26   : > { %p2392_p3 = pnand %p2390_p4, %p2354_p0  ;;  %p2399_p9 = por %p2398_p6, %p2397_p11 }
  0x28   : > { %p2393_p7 = pneg %p2392_p3 }
  0x2a   : > { %p2400_p12 = pnand %p2399_p9, %p2393_p7 }
  0x2c   : > { %2403 = shalt.err (!%p2400_p12)
}
  0x2d   : > { %1998 = dma.hbm_to_vmem [thread:$0]  (!%p2608_p2), %s3170_s3, 1024, %s192_s12, [#allocation6], %s2502_s14, %s2502_s14, %s2503_s15  }
  0x2e   : > { %p1573_p8 = scmp.ge.s32.totalorder %s2498_s21, 4 }
  0x30   : > { %204 = sbr.rel (%p1573_p8) target bundleno = 85 (0x55), region = 32 }
  0x35   : > { %207 = sbr.rel (!%p2579_p5) target bundleno = 85 (0x55), region = 36  ;;  %s208_s8 = sand.u32 (%p2579_p5), 1, %s2494_s20  }
  0x36   : > { %s1575_s9 = sshll.u32 (%p2579_p5), %s2498_s21, 5  ;;  %s1574_s11 = sshll.u32 (%p2579_p5), %s208_s8, 8 }
  0x37   : > { %s214_s13 = ssub.s32 (%p2579_p5), 125, %s1575_s9  ;;  %s2638_s17 = scalar_lea.sflag (%p2579_p5), [#allocation3], %s208_s8 }
  0x38   : > { %p215_p4 = scmp.lt.s32.totalorder (%p2579_p5), %s214_s13, 32  ;;  %s212_s12 = scalar_lea.vmem (%p2579_p5), [#allocation2], %s1574_s11 }
  0x3a   : > { %s3191_s13 = smov (!%p215_p4, %s214_s13), 32 }
  0x3b   : > { %s2635_s16 = sshll.u32 %s3191_s13, 7 }
  0x3c   : > { %s219_s10 = ssub.s32 4096, %s2635_s16 }
  0x3d   : > { %220 = vsyncadd %s2638_s17, %s219_s10  ;;  %p1577_p5 = scmp.ne.s32.totalorder %s2635_s16, 0  ;;  %s1709_s28 = sshll.u32 %s2498_s21, 12 }
  0x3e   : > { %s2646_s23 = scalar_lea.hbm %s3167_s0, %s1709_s28  ;;  %s225_s25 = sshll.u32 %s212_s12, 4  ;;  %s2648_s25 = int_to_ptr.vmem [resolvable:$true] %s225_s25 }
  0x3f   : > { %s2404_s26 = scalar_lea.hbm %s2646_s23, %s2635_s16  ;;  %s2408_s11 = scalar_lea.hbm %s3167_s0, 16000 }
  0x40   : > { %p2405_p6 = scmp.ne.s32.totalorder %s2646_s23, %s2404_s26  ;;  %p2409_p0 = scmp.lt.s32.totalorder %s2646_s23, %s3167_s0 }
  0x41   : > { %p2410_p10 = scmp.lt.s32.totalorder %s2408_s11, %s2404_s26 }
  0x42   : > { %p2406_p11 = pnand %p2405_p6, %p1577_p5 }
  0x43   : > { %p2411_p1 = por %p2410_p10, %p2409_p0 }
  0x44   : > { %p2407_p2 = pneg %p2406_p11 }
  0x46   : > { %p2412_p3 = pnand %p2411_p1, %p2407_p2 }
  0x48   : > { %2415 = shalt.err (!%p2412_p3)
}
  0x49   : > { %s2416_s12 = scalar_lea.vmem %s2648_s25, %s2635_s16  ;;  %s2504_s28 = smov [#allocation2]  }
  0x4a   : > { %p2417_p7 = scmp.ne.s32.totalorder %s2648_s25, %s2416_s12  ;;  %s2420_s14 = sshll.u32 %s2504_s28, 4  ;;  %s2421_s14 = int_to_ptr.vmem [resolvable:$false] %s2420_s14 }
  0x4b   : > { %s2422_s15 = scalar_lea.vmem %s2421_s14, 8192  ;;  %p2423_p8 = scmp.lt.s32.totalorder %s2648_s25, %s2421_s14 }
  0x4c   : > { %p2418_p9 = pnand %p2417_p7, %p1577_p5  ;;  %p2424_p4 = scmp.lt.s32.totalorder %s2422_s15, %s2416_s12 }
  0x4e   : > { %p2419_p12 = pneg %p2418_p9  ;;  %p2425_p6 = por %p2424_p4, %p2423_p8 }
  0x50   : > { %p2426_p11 = pnand %p2425_p6, %p2419_p12 }
  0x52   : > { %2429 = shalt.err (!%p2426_p11)
}
  0x53   : > { %s2505_s26 = smov 128   ;;  %s2506_s8 = smov 8  }
  0x54   : > { %231 = dma.hbm_to_vmem [thread:$0]  (%p1577_p5), %s2646_s23, %s2635_s16, %s2648_s25, %s2638_s17, %s2505_s26, %s2505_s26, %s2506_s8  }
  0x55 PF: > { %237 = sbr.rel (%p2600_p13) target bundleno = 690 (0x2b2), region = 40  ;;  %s2677_s9 = sand.u32 (!%p2600_p13), 1, %s2490_s19  }
  0x56   : > { %s1582_s11 = sshll.u32 (!%p2600_p13), %s2677_s9, 8  ;;  %s240_s13 = scalar_lea.sflag (!%p2600_p13), [#allocation3], %s2677_s9 }
  0x57   : > { %s2681_s10 = scalar_lea.vmem (!%p2600_p13), [#allocation2], %s1582_s11  ;;  %p3181_p2 = scmp.ne.s32.totalorder (!%p2600_p13), %s3176_s29, 0 }
  0x5a   : > { %2473 = dma.done.wait (%p3181_p2), %s240_s13, 4096  }
  0x5b   : > { %2475 = vsyncadd (%p3181_p2), %s240_s13, 4294963200  ;;  %p3182_p5 = scmp.eq.s32.totalorder %s2561_s22, 0 }
  0x5d   : > { %2477 = dma.done.wait (%p3182_p5), [#allocation6], 2048   ;;  %p3183_p13 = pmov %p3182_p5 }
  0x5e   : > { %v2048_v0 = vld [vmem:[#allocation5 + $0x38] sm:$0xff]   ;;  %v2049_v1 = vld [vmem:[#allocation5 + $0x30] sm:$0xff]   ;;  %v2050_v2 = vld [vmem:[#allocation5 + $0x28] sm:$0xff]   ;;  %s1585_s23 = sshll.u32 %s2677_s9, 7  ;;  %s1458_s12 = scalar_lea.sflag [#allocation4], %s2677_s9 }
  0x5f   : > { %2479 = vsyncadd (%p3183_p13), [#allocation6], 4294965248  ;;  %1886 = vmatprep.subr.bf16.mxu0 %v2048_v0  ;;  %v2051_v3 = vld [vmem:[#allocation5 + $0x20] sm:$0xff]   ;;  %v290_v5 = vld [vmem:[%s2681_s10 + $0x8] sm:$0xff]  ;;  %s2992_s25 = scalar_lea.vmem [#allocation8], %s1585_s23  ;;  %p3184_p0 = scmp.ne.s32.totalorder %s3177_s30, 0 }
  0x60   : > { %1887 = vmatpush3.bf16.msra.mxu0 %v2048_v0  ;;  %v289_v4 = vld [vmem:[%s2681_s10] sm:$0xff]  ;;  %v2052_v7 = vld [vmem:[#allocation5 + $0x18] sm:$0xff]   ;;  %v2053_v8 = vld [vmem:[#allocation5 + $0x10] sm:$0xff]   ;;  %s1701_s28 = sshll.u32 (%p3184_p0), %s2561_s22, 5 }
  0x61   : > { %1888 = vmatprep.subr.bf16.mxu0 %v2049_v1  ;;  %v321_v6 = vpack.c.bf16 %v290_v5, %v289_v4  ;;  %v2054_v9 = vld [vmem:[#allocation5 + $0x8] sm:$0xff]   ;;  %v2055_v10 = vld [vmem:[#allocation5] sm:$0xff]   ;;  %v291_v11 = vld [vmem:[%s2681_s10 + $0x10] sm:$0xff]  ;;  %s1466_s14 = ssub.s32 (%p3184_p0), 125, %s1701_s28 }
  0x62   : > { %v292_v12 = vld [vmem:[%s2681_s10 + $0x18] sm:$0xff]  ;;  %v293_v13 = vld [vmem:[%s2681_s10 + $0x20] sm:$0xff]  ;;  %v294_v14 = vld [vmem:[%s2681_s10 + $0x28] sm:$0xff]  ;;  %p1467_p10 = scmp.lt.s32.totalorder (%p3184_p0), %s1466_s14, 32 }
  0x63   : > { %1902 = vmatprep.mubr.bf16.mxu0 %v321_v6  ;;  %v322_v15 = vpack.c.bf16 %v292_v12, %v291_v11  ;;  %v323_v16 = vpack.c.bf16 %v294_v14, %v293_v13  ;;  %v295_v17 = vld [vmem:[%s2681_s10 + $0x30] sm:$0xff]  ;;  %v296_v18 = vld [vmem:[%s2681_s10 + $0x38] sm:$0xff]  ;;  %v297_v19 = vld [vmem:[%s2681_s10 + $0x40] sm:$0xff] }
  0x64   : > { %1889 = vmatpush3.bf16.msra.mxu0 %v2049_v1  ;;  %v298_v20 = vld [vmem:[%s2681_s10 + $0x48] sm:$0xff]  ;;  %v324_v21 = vpack.c.bf16 %v296_v18, %v295_v17  ;;  %v299_v23 = vld [vmem:[%s2681_s10 + $0x50] sm:$0xff]  ;;  %v300_v24 = vld [vmem:[%s2681_s10 + $0x58] sm:$0xff] }
  0x65   : > { %1890 = vmatprep.subr.bf16.mxu0 %v2050_v2  ;;  %v325_v22 = vpack.c.bf16 %v298_v20, %v297_v19  ;;  %v301_v25 = vld [vmem:[%s2681_s10 + $0x60] sm:$0xff]  ;;  %v302_v26 = vld [vmem:[%s2681_s10 + $0x68] sm:$0xff]  ;;  %v326_v27 = vpack.c.bf16 %v300_v24, %v299_v23  ;;  %v303_v29 = vld [vmem:[%s2681_s10 + $0x70] sm:$0xff] }
  0x66   : > { %v327_v28 = vpack.c.bf16 %v302_v26, %v301_v25  ;;  %v304_v30 = vld [vmem:[%s2681_s10 + $0x78] sm:$0xff]  ;;  %v305_v31 = vld [vmem:[%s2681_s10 + $0x80] sm:$0xff]  ;;  %v306_v32 = vld [vmem:[%s2681_s10 + $0x88] sm:$0xff] }
  0x67   : > { %v328_v33 = vpack.c.bf16 %v304_v30, %v303_v29  ;;  %v329_v34 = vpack.c.bf16 %v306_v32, %v305_v31  ;;  %v307_v35 = vld [vmem:[%s2681_s10 + $0x90] sm:$0xff]  ;;  %v308_v36 = vld [vmem:[%s2681_s10 + $0x98] sm:$0xff]  ;;  %v309_v37 = vld [vmem:[%s2681_s10 + $0xa0] sm:$0xff] }
  0x68   : > { %1891 = vmatpush3.bf16.msra.mxu0 %v2050_v2  ;;  %v310_v38 = vld [vmem:[%s2681_s10 + $0xa8] sm:$0xff]  ;;  %v330_v39 = vpack.c.bf16 %v308_v36, %v307_v35  ;;  %v311_v41 = vld [vmem:[%s2681_s10 + $0xb0] sm:$0xff]  ;;  %v312_v42 = vld [vmem:[%s2681_s10 + $0xb8] sm:$0xff] }
  0x69   : > { %1892 = vmatprep.subr.bf16.mxu0 %v2051_v3  ;;  %v331_v40 = vpack.c.bf16 %v310_v38, %v309_v37  ;;  %v313_v43 = vld [vmem:[%s2681_s10 + $0xc0] sm:$0xff]  ;;  %v314_v44 = vld [vmem:[%s2681_s10 + $0xc8] sm:$0xff]  ;;  %v332_v45 = vpack.c.bf16 %v312_v42, %v311_v41  ;;  %v315_v47 = vld [vmem:[%s2681_s10 + $0xd0] sm:$0xff] }
  0x6a   : > { %v333_v46 = vpack.c.bf16 %v314_v44, %v313_v43  ;;  %v316_v48 = vld [vmem:[%s2681_s10 + $0xd8] sm:$0xff]  ;;  %v317_v49 = vld [vmem:[%s2681_s10 + $0xe0] sm:$0xff]  ;;  %v318_v50 = vld [vmem:[%s2681_s10 + $0xe8] sm:$0xff] }
  0x6b   : > { %v334_v51 = vpack.c.bf16 %v316_v48, %v315_v47  ;;  %v335_v52 = vpack.c.bf16 %v318_v50, %v317_v49  ;;  %v319_v53 = vld [vmem:[%s2681_s10 + $0xf0] sm:$0xff]  ;;  %v320_v54 = vld [vmem:[%s2681_s10 + $0xf8] sm:$0xff]  ;;  %v2058_v58 = vld [vmem:[#allocation7 + $0x28] sm:$0xff]  }
  0x6c   : > { %1893 = vmatpush3.bf16.msra.mxu0 %v2051_v3  ;;  %v336_v55 = vpack.c.bf16 %v320_v54, %v319_v53  ;;  %v2056_v56 = vld [vmem:[#allocation7 + $0x38] sm:$0xff]   ;;  %v2057_v57 = vld [vmem:[#allocation7 + $0x30] sm:$0xff]   ;;  %v2059_v59 = vld [vmem:[#allocation7 + $0x20] sm:$0xff]  }
  0x6d   : > { %1894 = vmatprep.subr.bf16.mxu0 %v2052_v7  ;;  %1934 = vmatprep.subr.bf16.mxu1 %v2056_v56  ;;  %v2060_v60 = vld [vmem:[#allocation7 + $0x18] sm:$0xff]   ;;  %v2061_v61 = vld [vmem:[#allocation7 + $0x10] sm:$0xff]   ;;  %v2062_v62 = vld [vmem:[#allocation7 + $0x8] sm:$0xff]  }
  0x6e   : > { %1935 = vmatpush3.bf16.msra.mxu1 %v2056_v56  ;;  %v2063_v63 = vld [vmem:[#allocation7] sm:$0xff]  }
  0x6f   : > { %1936 = vmatprep.subr.bf16.mxu1 %v2057_v57  ;;  %v2726_v0 = vld [vmem:[%s3169_s2] ss:$0 sm:$0xff] }
  0x70   : > { %1895 = vmatpush3.bf16.msra.mxu0 %v2052_v7 }
  0x71   : > { %1896 = vmatprep.subr.bf16.mxu0 %v2053_v8 }
  0x72   : > { %1937 = vmatpush3.bf16.msra.mxu1 %v2057_v57 }
  0x73   : > { %1938 = vmatprep.subr.bf16.mxu1 %v2058_v58 }
  0x74   : > { %1897 = vmatpush3.bf16.msra.mxu0 %v2053_v8 }
  0x75   : > { %1898 = vmatprep.subr.bf16.mxu0 %v2054_v9 }
  0x76   : > { %1939 = vmatpush3.bf16.msra.mxu1 %v2058_v58 }
  0x77   : > { %1940 = vmatprep.subr.bf16.mxu1 %v2059_v59 }
  0x78   : > { %1899 = vmatpush3.bf16.msra.mxu0 %v2054_v9 }
  0x79   : > { %1900 = vmatprep.subr.bf16.mxu0 %v2055_v10 }
  0x7a   : > { %1941 = vmatpush3.bf16.msra.mxu1 %v2059_v59 }
  0x7b   : > { %1942 = vmatprep.subr.bf16.mxu1 %v2060_v60 }
  0x7c   : > { %1901 = vmatpush3.bf16.msra.mxu0 %v2055_v10 }
  0x7e   : > { %1943 = vmatpush3.bf16.msra.mxu1 %v2060_v60 }
  0x7f   : > { %1903 = vmatmul.mubr.bf16.vlgmr.msra.gmra.mxu0 %v322_v15  ;;  %1944 = vmatprep.subr.bf16.mxu1 %v2061_v61 }
  0x80   : > { %1906 = vmatprep.mubr.bf16.mxu0 %v323_v16 }
  0x82   : > { %1945 = vmatpush3.bf16.msra.mxu1 %v2061_v61 }
  0x83   : > { %1946 = vmatprep.subr.bf16.mxu1 %v2062_v62 }
  0x86   : > { %1947 = vmatpush3.bf16.msra.mxu1 %v2062_v62 }
  0x87   : > { %1907 = vmatmul.mubr.bf16.gmra.mxu0 %v324_v21  ;;  %1948 = vmatprep.subr.bf16.mxu1 %v2063_v63 }
  0x88   : > { %1910 = vmatprep.mubr.bf16.mxu0 %v325_v22 }
  0x8a   : > { %1949 = vmatpush3.bf16.msra.mxu1 %v2063_v63 }
  0x8f   : > { %1911 = vmatmul.mubr.bf16.gmra.mxu0 %v326_v27 }
  0x90   : > { %1914 = vmatprep.mubr.bf16.mxu0 %v327_v28 }
  0x97   : > { %1915 = vmatmul.mubr.bf16.gmra.mxu0 %v328_v33 }
  0x98   : > { %1918 = vmatprep.mubr.bf16.mxu0 %v329_v34 }
  0x9f   : > { %1919 = vmatmul.mubr.bf16.gmra.mxu0 %v330_v39 }
  0xa0   : > { %1922 = vmatprep.mubr.bf16.mxu0 %v331_v40 }
  0xa7   : > { %1923 = vmatmul.mubr.bf16.gmra.mxu0 %v332_v45 }
  0xa8   : > { %1926 = vmatprep.mubr.bf16.mxu0 %v333_v46 }
  0xaf   : > { %1927 = vmatmul.mubr.bf16.gmra.mxu0 %v334_v51 }
  0xb0   : > { %1930 = vmatprep.mubr.bf16.mxu0 %v335_v52 }
  0xb7   : > { %1931 = vmatmul.mubr.bf16.gmra.mxu0 %v336_v55 }
 0x13f   : > { %v1904_v1 = vpop.f32.mrf.mxu0 }
 0x140   : > { %v2729_v2 = vadd.f32 %v1904_v1, %v2726_v0 }
 0x141   : > { %v442_v3 = vpop.f32.mrf.mxu0 }
 0x142   : > { %v1597_v4 = vmul.f32 -1.442695, %v2729_v2  ;;  %v2733_v5 = vadd.f32 %v2726_v0, %v442_v3 }
 0x143   : > { %v1905_v6 = vpop.f32.mrf.mxu0 }
 0x144   : > { %2064 = vpow2.f32 %v1597_v4  ;;  %v1595_v7 = vmul.f32 -1.442695, %v2733_v5  ;;  %v2737_v8 = vadd.f32 %v1905_v6, %v2726_v0 }
 0x145   : > { %v445_v9 = vpop.f32.mrf.mxu0 }
 0x146   : > { %2066 = vpow2.f32 %v1595_v7  ;;  %v1598_v10 = vmul.f32 -1.442695, %v2737_v8  ;;  %v2741_v11 = vadd.f32 %v2726_v0, %v445_v9 }
 0x147   : > { %v1908_v12 = vpop.f32.mrf.mxu0 }
 0x148   : > { %2068 = vpow2.f32 %v1598_v10  ;;  %v1596_v13 = vmul.f32 -1.442695, %v2741_v11  ;;  %v2745_v14 = vadd.f32 %v1908_v12, %v2726_v0 }
 0x149   : > { %v458_v15 = vpop.f32.mrf.mxu0 }
 0x14a   : > { %2070 = vpow2.f32 %v1596_v13  ;;  %v1601_v16 = vmul.f32 -1.442695, %v2745_v14  ;;  %v2749_v17 = vadd.f32 %v2726_v0, %v458_v15 }
 0x14b   : > { %v1909_v18 = vpop.f32.mrf.mxu0 }
 0x14c   : > { %2072 = vpow2.f32 %v1601_v16  ;;  %v1599_v19 = vmul.f32 -1.442695, %v2749_v17  ;;  %v2753_v20 = vadd.f32 %v1909_v18, %v2726_v0 }
 0x14d   : > { %v461_v21 = vpop.f32.mrf.mxu0 }
 0x14e   : > { %2074 = vpow2.f32 %v1599_v19  ;;  %v1602_v22 = vmul.f32 -1.442695, %v2753_v20  ;;  %v2757_v23 = vadd.f32 %v2726_v0, %v461_v21 }
 0x14f   : > { %v1912_v24 = vpop.f32.mrf.mxu0 }
 0x150   : > { %2076 = vpow2.f32 %v1602_v22  ;;  %v1600_v25 = vmul.f32 -1.442695, %v2757_v23  ;;  %v2761_v26 = vadd.f32 %v1912_v24, %v2726_v0 }
 0x151   : > { %v2065_v27 = vpop.eup %2064  ;;  %v474_v28 = vpop.f32.mrf.mxu0 }
 0x152   : > { %v667_v29 = vadd.f32 1.0, %v2065_v27  ;;  %2078 = vpow2.f32 %v1600_v25  ;;  %v1605_v30 = vmul.f32 -1.442695, %v2761_v26  ;;  %v2765_v31 = vadd.f32 %v2726_v0, %v474_v28 }
 0x153   : > { %v2067_v32 = vpop.eup %2066  ;;  %v1913_v33 = vpop.f32.mrf.mxu0 }
 0x154   : > { %2080 = vrcp.f32 %v667_v29  ;;  %v665_v34 = vadd.f32 1.0, %v2067_v32  ;;  %v1603_v35 = vmul.f32 -1.442695, %v2765_v31  ;;  %v2769_v36 = vadd.f32 %v1913_v33, %v2726_v0 }
 0x155   : > { %v2069_v37 = vpop.eup %2068  ;;  %2082 = vpow2.f32 %v1605_v30  ;;  %v477_v38 = vpop.f32.mrf.mxu0 }
 0x156   : > { %2084 = vrcp.f32 %v665_v34  ;;  %v668_v39 = vadd.f32 1.0, %v2069_v37  ;;  %v1606_v40 = vmul.f32 -1.442695, %v2769_v36  ;;  %v2773_v41 = vadd.f32 %v2726_v0, %v477_v38 }
 0x157   : > { %v2071_v42 = vpop.eup %2070  ;;  %2086 = vpow2.f32 %v1603_v35  ;;  %v1916_v43 = vpop.f32.mrf.mxu0 }
 0x158   : > { %2088 = vrcp.f32 %v668_v39  ;;  %v666_v44 = vadd.f32 1.0, %v2071_v42  ;;  %v1604_v45 = vmul.f32 -1.442695, %v2773_v41  ;;  %v2777_v46 = vadd.f32 %v1916_v43, %v2726_v0 }
 0x159   : > { %v2073_v47 = vpop.eup %2072  ;;  %2090 = vpow2.f32 %v1606_v40  ;;  %v490_v48 = vpop.f32.mrf.mxu0 }
 0x15a   : > { %2092 = vrcp.f32 %v666_v44  ;;  %v671_v49 = vadd.f32 1.0, %v2073_v47  ;;  %v1609_v50 = vmul.f32 -1.442695, %v2777_v46  ;;  %v2781_v51 = vadd.f32 %v2726_v0, %v490_v48 }
 0x15b   : > { %v2075_v52 = vpop.eup %2074  ;;  %2094 = vpow2.f32 %v1604_v45  ;;  %v1917_v53 = vpop.f32.mrf.mxu0 }
 0x15c   : > { %2096 = vrcp.f32 %v671_v49  ;;  %v669_v54 = vadd.f32 1.0, %v2075_v52  ;;  %v1607_v55 = vmul.f32 -1.442695, %v2781_v51  ;;  %v2785_v56 = vadd.f32 %v1917_v53, %v2726_v0 }
 0x15d   : > { %v2077_v57 = vpop.eup %2076  ;;  %2098 = vpow2.f32 %v1609_v50  ;;  %v493_v58 = vpop.f32.mrf.mxu0 }
 0x15e   : > { %2100 = vrcp.f32 %v669_v54  ;;  %v672_v59 = vadd.f32 1.0, %v2077_v57  ;;  %v1610_v60 = vmul.f32 -1.442695, %v2785_v56  ;;  %v2789_v61 = vadd.f32 %v2726_v0, %v493_v58 }
 0x15f   : > { %v2079_v62 = vpop.eup %2078  ;;  %2102 = vpow2.f32 %v1607_v55  ;;  %v1920_v63 = vpop.f32.mrf.mxu0 }
 0x160   : > { %2104 = vrcp.f32 %v672_v59  ;;  %v670_v1 = vadd.f32 1.0, %v2079_v62  ;;  %v1608_v3 = vmul.f32 -1.442695, %v2789_v61  ;;  %v2793_v4 = vadd.f32 %v1920_v63, %v2726_v0 }
 0x161   : > { %v2081_v6 = vpop.eup %2080  ;;  %2106 = vpow2.f32 %v1610_v60  ;;  %v506_v7 = vpop.f32.mrf.mxu0 }
 0x162   : > { %v2083_v9 = vpop.eup %2082  ;;  %2108 = vrcp.f32 %v670_v1  ;;  %v1613_v10 = vmul.f32 -1.442695, %v2793_v4  ;;  %v2797_v12 = vadd.f32 %v2726_v0, %v506_v7 }
 0x163   : > { %v2085_v13 = vpop.eup %2084  ;;  %v675_v15 = vadd.f32 1.0, %v2083_v9  ;;  %2110 = vpow2.f32 %v1608_v3  ;;  %v1921_v16 = vpop.f32.mrf.mxu0 }
 0x164   : > { %v2087_v18 = vpop.eup %2086  ;;  %2112 = vpow2.f32 %v1613_v10  ;;  %v1611_v19 = vmul.f32 -1.442695, %v2797_v12  ;;  %v2801_v21 = vadd.f32 %v1921_v16, %v2726_v0  ;;  %v761_v44 = vmul.f32 %v2085_v13, %v2733_v5 }
 0x165   : > { %v2089_v22 = vpop.eup %2088  ;;  %2114 = vrcp.f32 %v675_v15  ;;  %v673_v24 = vadd.f32 1.0, %v2087_v18  ;;  %v509_v25 = vpop.f32.mrf.mxu0 }
 0x166   : > { %v2091_v27 = vpop.eup %2090  ;;  %2116 = vpow2.f32 %v1611_v19  ;;  %v1614_v28 = vmul.f32 -1.442695, %v2801_v21  ;;  %v2805_v29 = vadd.f32 %v2726_v0, %v509_v25  ;;  %v764_v32 = vmul.f32 %v2089_v22, %v2737_v8 }
 0x167   : > { %v2093_v30 = vpop.eup %2092  ;;  %2118 = vrcp.f32 %v673_v24  ;;  %v676_v33 = vadd.f32 1.0, %v2091_v27  ;;  %v1924_v34 = vpop.f32.mrf.mxu0  ;;  %v763_v8 = vmul.f32 %v2081_v6, %v2729_v2 }
 0x168   : > { %v2095_v35 = vpop.eup %2094  ;;  %2120 = vpow2.f32 %v1614_v28  ;;  %v1612_v37 = vmul.f32 -1.442695, %v2805_v29  ;;  %v2810_v38 = vadd.f32 %v1924_v34, %v2726_v0  ;;  %v762_v39 = vmul.f32 %v2093_v30, %v2741_v11 }
 0x169   : > { %v2097_v40 = vpop.eup %2096  ;;  %2122 = vrcp.f32 %v676_v33  ;;  %v674_v42 = vadd.f32 1.0, %v2095_v35  ;;  %v522_v43 = vpop.f32.mrf.mxu0  ;;  %v794_v55 = vpack.c.bf16 %v764_v32, %v763_v8 }
 0x16a   : > { %v2099_v45 = vpop.eup %2098  ;;  %2124 = vpow2.f32 %v1612_v37  ;;  %v1617_v47 = vmul.f32 -1.442695, %v2810_v38  ;;  %v2817_v48 = vadd.f32 %v2726_v0, %v522_v43  ;;  %v793_v11 = vpack.c.bf16 %v762_v39, %v761_v44 }
 0x16b   : > { %v2101_v49 = vpop.eup %2100  ;;  %2126 = vrcp.f32 %v674_v42  ;;  %v679_v50 = vadd.f32 1.0, %v2099_v45  ;;  %v1925_v52 = vpop.f32.mrf.mxu0  ;;  %v767_v16 = vmul.f32 %v2097_v40, %v2745_v14 }
 0x16c   : > { %v2103_v53 = vpop.eup %2102  ;;  %2128 = vpow2.f32 %v1617_v47  ;;  %v1615_v54 = vmul.f32 -1.442695, %v2817_v48  ;;  %v2821_v5 = vadd.f32 %v1925_v52, %v2726_v0  ;;  %1950 = vmatprep.mubr.bf16.mxu1 %v793_v11  ;;  %v765_v18 = vmul.f32 %v2101_v49, %v2749_v17 }
 0x16d   : > { %v2105_v2 = vpop.eup %2104  ;;  %2130 = vrcp.f32 %v679_v50  ;;  %v677_v57 = vadd.f32 1.0, %v2103_v53  ;;  %v525_v58 = vpop.f32.mrf.mxu0  ;;  %1951 = vmatmul.mubr.bf16.vlgmr.msra.gmra.mxu1 %v794_v55 }
 0x16e   : > { %v2107_v59 = vpop.eup %2106  ;;  %2132 = vpow2.f32 %v1615_v54  ;;  %v1618_v60 = vmul.f32 -1.442695, %v2821_v5  ;;  %v2825_v62 = vadd.f32 %v2726_v0, %v525_v58  ;;  %v768_v1 = vmul.f32 %v2105_v2, %v2753_v20 }
 0x16f   : > { %v2109_v63 = vpop.eup %2108  ;;  %2134 = vrcp.f32 %v677_v57  ;;  %v680_v3 = vadd.f32 1.0, %v2107_v59  ;;  %v1928_v6 = vpop.f32.mrf.mxu0 }
 0x170   : > { %v2111_v7 = vpop.eup %2110  ;;  %v766_v9 = vmul.f32 %v2109_v63, %v2757_v23  ;;  %2136 = vpow2.f32 %v1618_v60  ;;  %v1616_v10 = vmul.f32 -1.442695, %v2825_v62  ;;  %v2831_v13 = vadd.f32 %v1928_v6, %v2726_v0 }
 0x171   : > { %v2113_v15 = vpop.eup %2112  ;;  %2138 = vrcp.f32 %v680_v3  ;;  %v678_v19 = vadd.f32 1.0, %v2111_v7  ;;  %v538_v20 = vpop.f32.mrf.mxu0  ;;  %v796_v32 = vpack.c.bf16 %v768_v1, %v767_v16 }
 0x172   : > { %v2115_v22 = vpop.eup %2114  ;;  %v683_v24 = vadd.f32 1.0, %v2113_v15  ;;  %2140 = vpow2.f32 %v1616_v10  ;;  %v1621_v25 = vmul.f32 -1.442695, %v2831_v13  ;;  %v2837_v23 = vadd.f32 %v2726_v0, %v538_v20 }
 0x173   : > { %v2117_v27 = vpop.eup %2116  ;;  %2142 = vrcp.f32 %v678_v19  ;;  %v1929_v28 = vpop.f32.mrf.mxu0  ;;  %v795_v30 = vpack.c.bf16 %v766_v9, %v765_v18  ;;  %v771_v53 = vmul.f32 %v2115_v22, %v2761_v26 }
 0x174   : > { %v2119_v33 = vpop.eup %2118  ;;  %2144 = vrcp.f32 %v683_v24  ;;  %v681_v14 = vadd.f32 1.0, %v2117_v27  ;;  %v1619_v17 = vmul.f32 -1.442695, %v2837_v23  ;;  %v2841_v34 = vadd.f32 %v1929_v28, %v2726_v0 }
 0x175   : > { %v2121_v35 = vpop.eup %2120  ;;  %2146 = vpow2.f32 %v1621_v25  ;;  %1954 = vmatprep.mubr.bf16.mxu1 %v795_v30  ;;  %v541_v37 = vpop.f32.mrf.mxu0  ;;  %v769_v54 = vmul.f32 %v2119_v33, %v2765_v31 }
 0x176   : > { %v2123_v39 = vpop.eup %2122  ;;  %2148 = vrcp.f32 %v681_v14  ;;  %v684_v40 = vadd.f32 1.0, %v2121_v35  ;;  %v1622_v42 = vmul.f32 -1.442695, %v2841_v34  ;;  %v2845_v43 = vadd.f32 %v2726_v0, %v541_v37  ;;  %1955 = vmatmul.mubr.bf16.gmra.mxu1 %v796_v32 }
 0x177   : > { %v2125_v44 = vpop.eup %2124  ;;  %v772_v45 = vmul.f32 %v2123_v39, %v2769_v36  ;;  %2150 = vpow2.f32 %v1619_v17  ;;  %v1932_v8 = vpop.f32.mrf.mxu0 }
 0x178   : > { %v2127_v47 = vpop.eup %2126  ;;  %2152 = vrcp.f32 %v684_v40  ;;  %v682_v49 = vadd.f32 1.0, %v2125_v44  ;;  %v1620_v50 = vmul.f32 -1.442695, %v2845_v43  ;;  %v2850_v52 = vadd.f32 %v1932_v8, %v2726_v0 }
 0x179   : > { %v2129_v11 = vpop.eup %2128  ;;  %v770_v55 = vmul.f32 %v2127_v47, %v2773_v41  ;;  %2154 = vpow2.f32 %v1622_v42  ;;  %v554_v2 = vpop.f32.mrf.mxu0  ;;  %v798_v3 = vpack.c.bf16 %v772_v45, %v771_v53 }
 0x17a   : > { %v2131_v36 = vpop.eup %2130  ;;  %2156 = vrcp.f32 %v682_v49  ;;  %v687_v57 = vadd.f32 1.0, %v2129_v11  ;;  %v1625_v58 = vmul.f32 -1.442695, %v2850_v52  ;;  %v2857_v59 = vadd.f32 %v2726_v0, %v554_v2 }
 0x17b   : > { %v2133_v60 = vpop.eup %2132  ;;  %2158 = vpow2.f32 %v1620_v50  ;;  %v1933_v63 = vpop.f32.mrf.mxu0  ;;  %v797_v1 = vpack.c.bf16 %v770_v55, %v769_v54 }
 0x17c   : > { %v2135_v26 = vpop.eup %2134  ;;  %2160 = vrcp.f32 %v687_v57  ;;  %v685_v31 = vadd.f32 1.0, %v2133_v60  ;;  %v1623_v41 = vmul.f32 -1.442695, %v2857_v59  ;;  %v2861_v6 = vadd.f32 %v1933_v63, %v2726_v0 }
 0x17d   : > { %v2137_v7 = vpop.eup %2136  ;;  %2162 = vpow2.f32 %v1625_v58  ;;  %1958 = vmatprep.mubr.bf16.mxu1 %v797_v1  ;;  %v557_v9 = vpop.f32.mrf.mxu0  ;;  %v773_v28 = vmul.f32 %v2135_v26, %v2781_v51 }
 0x17e   : > { %v2139_v10 = vpop.eup %2138  ;;  %2164 = vrcp.f32 %v685_v31  ;;  %v688_v15 = vadd.f32 1.0, %v2137_v7  ;;  %v1626_v16 = vmul.f32 -1.442695, %v2861_v6  ;;  %v2865_v18 = vadd.f32 %v2726_v0, %v557_v9  ;;  %1959 = vmatmul.mubr.bf16.gmra.mxu1 %v798_v3 }
 0x17f   : > { %v2141_v19 = vpop.eup %2140  ;;  %2166 = vpow2.f32 %v1623_v41  ;;  %v776_v22 = vmul.f32 %v2139_v10, %v2785_v56  ;;  %v775_v0 = vmul.f32 %v2131_v36, %v2777_v46 }
 0x180   : > { %v2143_v20 = vpop.eup %2142  ;;  %2168 = vrcp.f32 %v688_v15  ;;  %v686_v24 = vadd.f32 1.0, %v2141_v19  ;;  %v1624_v25 = vmul.f32 -1.442695, %v2865_v18 }
 0x181   : > { %v2145_v27 = vpop.eup %2144  ;;  %v774_v30 = vmul.f32 %v2143_v20, %v2789_v61  ;;  %2170 = vpow2.f32 %v1626_v16  ;;  %v800_v35 = vpack.c.bf16 %v776_v22, %v775_v0 }
 0x182   : > { %v2147_v32 = vpop.eup %2146  ;;  %2172 = vrcp.f32 %v686_v24  ;;  %v779_v50 = vmul.f32 %v2145_v27, %v2793_v4 }
 0x183   : > { %v2149_v33 = vpop.eup %2148  ;;  %2174 = vpow2.f32 %v1624_v25  ;;  %v799_v14 = vpack.c.bf16 %v774_v30, %v773_v28  ;;  %v691_v40 = vadd.f32 1.0, %v2147_v32 }
 0x184   : > { %v2151_v17 = vpop.eup %2150  ;;  %v777_v61 = vmul.f32 %v2149_v33, %v2797_v12 }
 0x185   : > { %v2153_v56 = vpop.eup %2152  ;;  %v689_v37 = vadd.f32 1.0, %v2151_v17  ;;  %1962 = vmatprep.mubr.bf16.mxu1 %v799_v14 }
 0x186   : > { %v2155_v39 = vpop.eup %2154  ;;  %1963 = vmatmul.mubr.bf16.gmra.mxu1 %v800_v35  ;;  %v780_v45 = vmul.f32 %v2153_v56, %v2801_v21 }
 0x187   : > { %v2157_v42 = vpop.eup %2156  ;;  %v692_v51 = vadd.f32 1.0, %v2155_v39  ;;  %2176 = vrcp.f32 %v689_v37 }
 0x188   : > { %v2159_v44 = vpop.eup %2158  ;;  %v778_v46 = vmul.f32 %v2157_v42, %v2805_v29  ;;  %v802_v55 = vpack.c.bf16 %v780_v45, %v779_v50 }
 0x189   : > { %v2161_v8 = vpop.eup %2160  ;;  %2178 = vrcp.f32 %v692_v51  ;;  %v690_v47 = vadd.f32 1.0, %v2159_v44 }
 0x18a   : > { %v2163_v49 = vpop.eup %2162  ;;  %2180 = vrcp.f32 %v691_v40  ;;  %v801_v11 = vpack.c.bf16 %v778_v46, %v777_v61  ;;  %v783_v3 = vmul.f32 %v2161_v8, %v2810_v38 }
 0x18b   : > { %v2165_v53 = vpop.eup %2164  ;;  %2182 = vrcp.f32 %v690_v47  ;;  %v695_v21 = vadd.f32 1.0, %v2163_v49 }
 0x18c   : > { %v2167_v54 = vpop.eup %2166  ;;  %1966 = vmatprep.mubr.bf16.mxu1 %v801_v11  ;;  %v781_v60 = vmul.f32 %v2165_v53, %v2817_v48 }
 0x18d   : > { %v2169_v2 = vpop.eup %2168  ;;  %v693_v12 = vadd.f32 1.0, %v2167_v54 }
 0x18e   : > { %v2171_v36 = vpop.eup %2170  ;;  %1967 = vmatmul.mubr.bf16.gmra.mxu1 %v802_v55  ;;  %v784_v63 = vmul.f32 %v2169_v2, %v2821_v5 }
 0x18f   : > { %v2173_v29 = vpop.eup %2172  ;;  %v696_v57 = vadd.f32 1.0, %v2171_v36  ;;  %2184 = vrcp.f32 %v693_v12 }
 0x190   : > { %v2175_v58 = vpop.eup %2174  ;;  %v782_v4 = vmul.f32 %v2173_v29, %v2825_v62  ;;  %v804_v31 = vpack.c.bf16 %v784_v63, %v783_v3 }
 0x191   : > { %2186 = vrcp.f32 %v696_v57  ;;  %v694_v1 = vadd.f32 1.0, %v2175_v58 }
 0x192   : > { %2188 = vrcp.f32 %v695_v21  ;;  %v803_v26 = vpack.c.bf16 %v782_v4, %v781_v60 }
 0x193   : > { %2190 = vrcp.f32 %v694_v1 }
 0x194   : > { %1970 = vmatprep.mubr.bf16.mxu1 %v803_v26  ;;  %v2177_v41 = vpop.eup %2176 }
 0x195   : > { %v785_v5 = vmul.f32 %v2177_v41, %v2837_v23 }
 0x196   : > { %v2179_v7 = vpop.eup %2178  ;;  %1971 = vmatmul.mubr.bf16.gmra.mxu1 %v804_v31 }
 0x197   : > { %v2181_v9 = vpop.eup %2180  ;;  %v788_v48 = vmul.f32 %v2179_v7, %v2841_v34 }
 0x198   : > { %v2183_v10 = vpop.eup %2182  ;;  %v787_v15 = vmul.f32 %v2181_v9, %v2831_v13  ;;  %v2891_v13 = vld [vmem:[%s3171_s4] ss:$0 sm:$0xff] }
 0x199   : > { %v786_v62 = vmul.f32 %v2183_v10, %v2845_v43 }
 0x19a   : > { %v806_v38 = vpack.c.bf16 %v788_v48, %v787_v15 }
 0x19b   : > { %v805_v16 = vpack.c.bf16 %v786_v62, %v785_v5 }
 0x19c   : > { %v2185_v19 = vpop.eup %2184 }
 0x19d   : > { %1974 = vmatprep.mubr.bf16.mxu1 %v805_v16  ;;  %v789_v27 = vmul.f32 %v2185_v19, %v2857_v59 }
 0x19e   : > { %v2187_v20 = vpop.eup %2186  ;;  %1975 = vmatmul.mubr.bf16.gmra.mxu1 %v806_v38 }
 0x19f   : > { %v2189_v22 = vpop.eup %2188  ;;  %v792_v25 = vmul.f32 %v2187_v20, %v2861_v6 }
 0x1a0   : > { %v2191_v24 = vpop.eup %2190  ;;  %v791_v23 = vmul.f32 %v2189_v22, %v2850_v52 }
 0x1a1   : > { %v790_v34 = vmul.f32 %v2191_v24, %v2865_v18 }
 0x1a2   : > { %v808_v43 = vpack.c.bf16 %v792_v25, %v791_v23 }
 0x1a3   : > { %v807_v28 = vpack.c.bf16 %v790_v34, %v789_v27 }
 0x1a5   : > { %1978 = vmatprep.mubr.bf16.mxu1 %v807_v28 }
 0x1a6   : > { %1979 = vmatmul.mubr.bf16.gmra.mxu1 %v808_v43 }
 0x22d   : > { %v1952_v30 = vpop.f32.mrf.mxu1 }
 0x22e   : > { %v2894_v32 = vadd.f32 %v1952_v30, %v2891_v13 }
 0x22f   : > { %v914_v6 = vpop.f32.mrf.mxu1 }
 0x230   : > { %v1638_v59 = vmul.f32 -1.442695, %v2894_v32  ;;  %v2898_v18 = vadd.f32 %v2891_v13, %v914_v6 }
 0x231   : > { %v1953_v52 = vpop.f32.mrf.mxu1 }
 0x232   : > { %2192 = vpow2.f32 %v1638_v59  ;;  %v1636_v0 = vmul.f32 -1.442695, %v2898_v18  ;;  %v2902_v33 = vadd.f32 %v1953_v52, %v2891_v13 }
 0x233   : > { %v917_v14 = vpop.f32.mrf.mxu1 }
 0x234   : > { %2194 = vpow2.f32 %v1636_v0  ;;  %v1639_v17 = vmul.f32 -1.442695, %v2902_v33  ;;  %v2906_v35 = vadd.f32 %v2891_v13, %v917_v14 }
 0x236   : > { %v1956_v56 = vpop.f32.mrf.mxu1  ;;  %2196 = vpow2.f32 %v1639_v17  ;;  %v1637_v37 = vmul.f32 -1.442695, %v2906_v35 }
 0x237   : > { %v2910_v39 = vadd.f32 %v1956_v56, %v2891_v13 }
 0x238   : > { %v930_v40 = vpop.f32.mrf.mxu1  ;;  %2198 = vpow2.f32 %v1637_v37 }
 0x239   : > { %v1642_v42 = vmul.f32 -1.442695, %v2910_v39  ;;  %v2914_v51 = vadd.f32 %v2891_v13, %v930_v40 }
 0x23a   : > { %v1957_v44 = vpop.f32.mrf.mxu1 }
 0x23b   : > { %2200 = vpow2.f32 %v1642_v42  ;;  %v1640_v61 = vmul.f32 -1.442695, %v2914_v51  ;;  %v2918_v45 = vadd.f32 %v1957_v44, %v2891_v13 }
 0x23c   : > { %v933_v46 = vpop.f32.mrf.mxu1 }
 0x23d   : > { %2202 = vpow2.f32 %v1640_v61  ;;  %v1643_v8 = vmul.f32 -1.442695, %v2918_v45  ;;  %v2922_v47 = vadd.f32 %v2891_v13, %v933_v46 }
 0x23e   : > { %v1960_v49 = vpop.f32.mrf.mxu1 }
 0x23f   : > { %2204 = vpow2.f32 %v1643_v8  ;;  %v1641_v50 = vmul.f32 -1.442695, %v2922_v47  ;;  %v2926_v11 = vadd.f32 %v1960_v49, %v2891_v13  ;;  %v2193_v53 = vpop.eup %2192 }
 0x240   : > { %v946_v54 = vpop.f32.mrf.mxu1  ;;  %v1139_v55 = vadd.f32 1.0, %v2193_v53 }
 0x241   : > { %2206 = vpow2.f32 %v1641_v50  ;;  %v1646_v2 = vmul.f32 -1.442695, %v2926_v11  ;;  %v2930_v12 = vadd.f32 %v2891_v13, %v946_v54  ;;  %v2195_v36 = vpop.eup %2194 }
 0x242   : > { %v1961_v21 = vpop.f32.mrf.mxu1  ;;  %2208 = vrcp.f32 %v1139_v55  ;;  %v1137_v29 = vadd.f32 1.0, %v2195_v36 }
 0x243   : > { %v1644_v57 = vmul.f32 -1.442695, %v2930_v12  ;;  %v2934_v58 = vadd.f32 %v1961_v21, %v2891_v13  ;;  %v2197_v60 = vpop.eup %2196  ;;  %2210 = vpow2.f32 %v1646_v2  ;;  %v2320_v21 = vld [vmem:[%s2681_s10 + $0x10] sm:$0xff] }
 0x244   : > { %v949_v63 = vpop.f32.mrf.mxu1  ;;  %2212 = vrcp.f32 %v1137_v29  ;;  %v1140_v4 = vadd.f32 1.0, %v2197_v60 }
 0x245   : > { %v1647_v1 = vmul.f32 -1.442695, %v2934_v58  ;;  %v2938_v3 = vadd.f32 %v2891_v13, %v949_v63  ;;  %v2199_v26 = vpop.eup %2198  ;;  %2214 = vpow2.f32 %v1644_v57 }
 0x246   : > { %v1964_v31 = vpop.f32.mrf.mxu1  ;;  %2216 = vrcp.f32 %v1140_v4  ;;  %v1138_v41 = vadd.f32 1.0, %v2199_v26  ;;  %v2321_v4 = vld [vmem:[%s2681_s10 + $0x18] sm:$0xff] }
 0x247   : > { %v1645_v7 = vmul.f32 -1.442695, %v2938_v3  ;;  %v2942_v9 = vadd.f32 %v1964_v31, %v2891_v13  ;;  %2218 = vpow2.f32 %v1647_v1 }
 0x248   : > { %v2201_v10 = vpop.eup %2200  ;;  %v962_v48 = vpop.f32.mrf.mxu1  ;;  %2220 = vrcp.f32 %v1138_v41 }
 0x249   : > { %v1143_v5 = vadd.f32 1.0, %v2201_v10  ;;  %v1650_v62 = vmul.f32 -1.442695, %v2942_v9  ;;  %v2946_v15 = vadd.f32 %v2891_v13, %v962_v48  ;;  %2222 = vpow2.f32 %v1645_v7  ;;  %v2322_v7 = vld [vmem:[%s2681_s10] sm:$0xff] }
 0x24a   : > { %v2203_v16 = vpop.eup %2202  ;;  %v1965_v38 = vpop.f32.mrf.mxu1 }
 0x24b   : > { %2224 = vrcp.f32 %v1143_v5  ;;  %v1141_v19 = vadd.f32 1.0, %v2203_v16  ;;  %v1648_v20 = vmul.f32 -1.442695, %v2946_v15  ;;  %v2950_v22 = vadd.f32 %v1965_v38, %v2891_v13  ;;  %v2323_v38 = vld [vmem:[%s2681_s10 + $0x8] sm:$0xff] }
 0x24c   : > { %v2205_v24 = vpop.eup %2204  ;;  %2226 = vpow2.f32 %v1650_v62  ;;  %v965_v25 = vpop.f32.mrf.mxu1 }
 0x24d   : > { %2228 = vrcp.f32 %v1141_v19  ;;  %v1144_v27 = vadd.f32 1.0, %v2205_v24  ;;  %v1651_v34 = vmul.f32 -1.442695, %v2950_v22  ;;  %v2954_v23 = vadd.f32 %v2891_v13, %v965_v25 }
 0x24e   : > { %v2207_v28 = vpop.eup %2206  ;;  %2230 = vpow2.f32 %v1648_v20  ;;  %v1968_v43 = vpop.f32.mrf.mxu1 }
 0x24f   : > { %2232 = vrcp.f32 %v1144_v27  ;;  %v1142_v30 = vadd.f32 1.0, %v2207_v28  ;;  %v1649_v6 = vmul.f32 -1.442695, %v2954_v23  ;;  %v2958_v59 = vadd.f32 %v1968_v43, %v2891_v13  ;;  %v2209_v52 = vpop.eup %2208 }
 0x250   : > { %2234 = vpow2.f32 %v1651_v34  ;;  %v978_v0 = vpop.f32.mrf.mxu1  ;;  %v2211_v14 = vpop.eup %2210  ;;  %v1235_v40 = vmul.f32 %v2209_v52, %v2894_v32 }
 0x251   : > { %2236 = vrcp.f32 %v1142_v30  ;;  %v1654_v17 = vmul.f32 -1.442695, %v2958_v59  ;;  %v2962_v56 = vadd.f32 %v2891_v13, %v978_v0  ;;  %v2213_v37 = vpop.eup %2212  ;;  %v1147_v42 = vadd.f32 1.0, %v2211_v14 }
 0x252   : > { %2238 = vpow2.f32 %v1649_v6  ;;  %v1969_v44 = vpop.f32.mrf.mxu1  ;;  %v2215_v61 = vpop.eup %2214  ;;  %v1233_v49 = vmul.f32 %v2213_v37, %v2898_v18  ;;  %v1267_v29 = vadd.f32 %v2320_v21, %v1235_v40 }
 0x253   : > { %2240 = vpow2.f32 %v1654_v17  ;;  %v1652_v46 = vmul.f32 -1.442695, %v2962_v56  ;;  %v2217_v8 = vpop.eup %2216  ;;  %v1145_v50 = vadd.f32 1.0, %v2215_v61  ;;  %v2968_v53 = vadd.f32 %v1969_v44, %v2891_v13 }
 0x254   : > { %2242 = vrcp.f32 %v1147_v42  ;;  %v981_v54 = vpop.f32.mrf.mxu1  ;;  %v2219_v55 = vpop.eup %2218  ;;  %v1236_v32 = vmul.f32 %v2217_v8, %v2902_v33  ;;  %v1265_v10 = vadd.f32 %v2322_v7, %v1233_v49  ;;  %v2324_v42 = vld [vmem:[%s2681_s10 + $0x30] sm:$0xff] }
 0x255   : > { %2244 = vpow2.f32 %v1652_v46  ;;  %v2973_v2 = vadd.f32 %v2891_v13, %v981_v54  ;;  %v2221_v36 = vpop.eup %2220  ;;  %v1148_v18 = vadd.f32 1.0, %v2219_v55  ;;  %v1655_v57 = vmul.f32 -1.442695, %v2968_v53  ;;  %v2326_v55 = vld [vmem:[%s2681_s10 + $0x38] sm:$0xff] }
 0x256   : > { %2246 = vrcp.f32 %v1145_v50  ;;  %v1972_v60 = vpop.f32.mrf.mxu1  ;;  %v2223_v63 = vpop.eup %2222  ;;  %v1268_v1 = vadd.f32 %v2321_v4, %v1236_v32  ;;  %v1234_v26 = vmul.f32 %v2221_v36, %v2906_v35  ;;  %v2325_v50 = vld [vmem:[%s2681_s10 + $0x20] sm:$0xff]  ;;  %v2327_v4 = vld [vmem:[%s2681_s10 + $0x28] sm:$0xff] }
 0x257   : > { %v1653_v33 = vmul.f32 -1.442695, %v2973_v2  ;;  %v2981_v31 = vadd.f32 %v1972_v60, %v2891_v13  ;;  %2248 = vrcp.f32 %v1148_v18  ;;  %v1146_v48 = vadd.f32 1.0, %v2223_v63 }
 0x258   : > { %v2225_v41 = vpop.eup %2224  ;;  %v994_v5 = vpop.f32.mrf.mxu1  ;;  %v1751_v16 = vpack.c.bf16 %v1268_v1, %v1267_v29  ;;  %v1266_v19 = vadd.f32 %v2323_v38, %v1234_v26  ;;  %2250 = vpow2.f32 %v1655_v57 }
 0x259   : > { %v2227_v62 = vpop.eup %2226  ;;  %v1239_v20 = vmul.f32 %v2225_v41, %v2910_v39  ;;  %2252 = vrcp.f32 %v1146_v48  ;;  %v1658_v25 = vmul.f32 -1.442695, %v2981_v31  ;;  %v2988_v27 = vadd.f32 %v2891_v13, %v994_v5 }
 0x25a   : > { %v2229_v35 = vpop.eup %2228  ;;  %v1151_v24 = vadd.f32 1.0, %v2227_v62  ;;  %v1973_v34 = vpop.f32.mrf.mxu1  ;;  %1823 = vst [vmem:[%s2992_s25 + $0x8] sm:$0xff] %v1751_v16   ;;  %v1746_v43 = vpack.c.bf16 %v1266_v19, %v1265_v10  ;;  %2254 = vpow2.f32 %v1653_v33 }
 0x25b   : > { %v2231_v28 = vpop.eup %2230  ;;  %v1237_v39 = vmul.f32 %v2229_v35, %v2914_v51  ;;  %v1656_v52 = vmul.f32 -1.442695, %v2988_v27  ;;  %v2998_v0 = vadd.f32 %v1973_v34, %v2891_v13  ;;  %v1271_v44 = vadd.f32 %v2324_v42, %v1239_v20 }
 0x25c   : > { %v2233_v30 = vpop.eup %2232  ;;  %2256 = vrcp.f32 %v1151_v24  ;;  %v1149_v6 = vadd.f32 1.0, %v2231_v28  ;;  %v997_v14 = vpop.f32.mrf.mxu1  ;;  %1747 = vst [vmem:[%s2992_s25] sm:$0xff] %v1746_v43  }
 0x25d   : > { %v2235_v17 = vpop.eup %2234  ;;  %v1240_v37 = vmul.f32 %v2233_v30, %v2918_v45  ;;  %2258 = vpow2.f32 %v1658_v25  ;;  %v3003_v40 = vadd.f32 %v2891_v13, %v997_v14  ;;  %v1659_v46 = vmul.f32 -1.442695, %v2998_v0  ;;  %v2328_v14 = vld [vmem:[%s2681_s10 + $0x50] sm:$0xff] }
 0x25e   : > { %v2237_v51 = vpop.eup %2236  ;;  %2260 = vrcp.f32 %v1149_v6  ;;  %v1152_v61 = vadd.f32 1.0, %v2235_v17  ;;  %v1976_v8 = vpop.f32.mrf.mxu1  ;;  %v1269_v54 = vadd.f32 %v2325_v50, %v1237_v39 }
 0x25f   : > { %v2239_v49 = vpop.eup %2238  ;;  %v1272_v32 = vadd.f32 %v2326_v55, %v1240_v37  ;;  %v1238_v45 = vmul.f32 %v2237_v51, %v2922_v47  ;;  %2262 = vpow2.f32 %v1656_v52  ;;  %v1657_v29 = vmul.f32 -1.442695, %v3003_v40  ;;  %v2329_v37 = vld [vmem:[%s2681_s10 + $0x58] sm:$0xff]  ;;  %v2331_v55 = vld [vmem:[%s2681_s10 + $0x48] sm:$0xff] }
 0x260   : > { %v2241_v36 = vpop.eup %2240  ;;  %2264 = vrcp.f32 %v1152_v61  ;;  %v1150_v21 = vadd.f32 1.0, %v2239_v49  ;;  %v3012_v18 = vadd.f32 %v1976_v8, %v2891_v13  ;;  %v1010_v57 = vpop.f32.mrf.mxu1  ;;  %v2330_v49 = vld [vmem:[%s2681_s10 + $0x40] sm:$0xff] }
 0x261   : > { %v2243_v60 = vpop.eup %2242  ;;  %v1761_v63 = vpack.c.bf16 %v1272_v32, %v1271_v44  ;;  %v1270_v1 = vadd.f32 %v2327_v4, %v1238_v45  ;;  %v1155_v26 = vadd.f32 1.0, %v2241_v36  ;;  %2266 = vpow2.f32 %v1659_v46 }
 0x262   : > { %v2245_v33 = vpop.eup %2244  ;;  %2268 = vrcp.f32 %v1150_v21  ;;  %v1662_v47 = vmul.f32 -1.442695, %v3012_v18  ;;  %v3017_v41 = vadd.f32 %v2891_v13, %v1010_v57  ;;  %v1977_v7 = vpop.f32.mrf.mxu1  ;;  %v1243_v16 = vmul.f32 %v2243_v60, %v2926_v11 }
 0x263   : > { %v2247_v10 = vpop.eup %2246  ;;  %1825 = vst [vmem:[%s2992_s25 + $0x18] sm:$0xff] %v1761_v63   ;;  %v1756_v48 = vpack.c.bf16 %v1270_v1, %v1269_v54  ;;  %2270 = vrcp.f32 %v1155_v26  ;;  %v1153_v5 = vadd.f32 1.0, %v2245_v33  ;;  %v3021_v62 = vadd.f32 %v1977_v7, %v2891_v13 }
 0x264   : > { %2272 = vpow2.f32 %v1657_v29  ;;  %v1660_v38 = vmul.f32 -1.442695, %v3017_v41  ;;  %v1013_v19 = vpop.f32.mrf.mxu1  ;;  %v2249_v20 = vpop.eup %2248  ;;  %v1241_v34 = vmul.f32 %v2247_v10, %v2930_v12  ;;  %v1275_v17 = vadd.f32 %v2328_v14, %v1243_v16 }
 0x265   : > { %1824 = vst [vmem:[%s2992_s25 + $0x10] sm:$0xff] %v1756_v48   ;;  %2274 = vrcp.f32 %v1153_v5  ;;  %v1663_v35 = vmul.f32 -1.442695, %v3021_v62  ;;  %v3028_v24 = vadd.f32 %v2891_v13, %v1013_v19  ;;  %v2251_v25 = vpop.eup %2250  ;;  %v1244_v28 = vmul.f32 %v2249_v20, %v2934_v58  ;;  %v2333_v20 = vld [vmem:[%s2681_s10 + $0x78] sm:$0xff] }
 0x266   : > { %2276 = vpow2.f32 %v1662_v47  ;;  %v1980_v11 = vpop.f32.mrf.mxu1  ;;  %v2253_v43 = vpop.eup %2252  ;;  %v1156_v39 = vadd.f32 1.0, %v2251_v25  ;;  %v1273_v50 = vadd.f32 %v2330_v49, %v1241_v34  ;;  %v2334_v34 = vld [vmem:[%s2681_s10 + $0x60] sm:$0xff] }
 0x267   : > { %2278 = vpow2.f32 %v1660_v38  ;;  %v1661_v30 = vmul.f32 -1.442695, %v3028_v24  ;;  %v3034_v6 = vadd.f32 %v1980_v11, %v2891_v13  ;;  %v2255_v52 = vpop.eup %2254  ;;  %v1276_v51 = vadd.f32 %v2329_v37, %v1244_v28  ;;  %v2332_v38 = vld [vmem:[%s2681_s10 + $0x70] sm:$0xff] }
 0x268   : > { %v1242_v12 = vmul.f32 %v2253_v43, %v2938_v3  ;;  %2280 = vpow2.f32 %v1663_v35  ;;  %v1026_v58 = vpop.f32.mrf.mxu1  ;;  %v1154_v44 = vadd.f32 1.0, %v2255_v52  ;;  %v2335_v43 = vld [vmem:[%s2681_s10 + $0x68] sm:$0xff] }
 0x269   : > { %v2257_v42 = vpop.eup %2256  ;;  %2282 = vrcp.f32 %v1156_v39  ;;  %v1666_v61 = vmul.f32 -1.442695, %v3034_v6  ;;  %v3041_v46 = vadd.f32 %v2891_v13, %v1026_v58  ;;  %v1771_v54 = vpack.c.bf16 %v1276_v51, %v1275_v17 }
 0x26a   : > { %v2259_v8 = vpop.eup %2258  ;;  %v1274_v32 = vadd.f32 %v2331_v55, %v1242_v12  ;;  %2284 = vpow2.f32 %v1661_v30  ;;  %v1981_v45 = vpop.f32.mrf.mxu1  ;;  %v1247_v63 = vmul.f32 %v2257_v42, %v2942_v9  ;;  %v2336_v55 = vld [vmem:[%s2681_s10 + $0x90] sm:$0xff] }
 0x26b   : > { %v2261_v3 = vpop.eup %2260  ;;  %2286 = vrcp.f32 %v1154_v44  ;;  %v1159_v36 = vadd.f32 1.0, %v2259_v8  ;;  %v1664_v21 = vmul.f32 -1.442695, %v3041_v46  ;;  %v3047_v29 = vadd.f32 %v1981_v45, %v2891_v13  ;;  %1827 = vst [vmem:[%s2992_s25 + $0x28] sm:$0xff] %v1771_v54  }
 0x26c   : > { %v2263_v57 = vpop.eup %2262  ;;  %v1766_v60 = vpack.c.bf16 %v1274_v32, %v1273_v50  ;;  %v1245_v4 = vmul.f32 %v2261_v3, %v2946_v15  ;;  %2288 = vpow2.f32 %v1666_v61  ;;  %v1029_v1 = vpop.f32.mrf.mxu1  ;;  %v1279_v19 = vadd.f32 %v2332_v38, %v1247_v63  ;;  %v2337_v32 = vld [vmem:[%s2681_s10 + $0x98] sm:$0xff]  ;;  %v2339_v63 = vld [vmem:[%s2681_s10 + $0x88] sm:$0xff] }
 0x26d   : > { %v2265_v26 = vpop.eup %2264  ;;  %2290 = vrcp.f32 %v1159_v36  ;;  %v1157_v33 = vadd.f32 1.0, %v2263_v57  ;;  %v1667_v47 = vmul.f32 -1.442695, %v3047_v29  ;;  %v3054_v7 = vadd.f32 %v2891_v13, %v1029_v1  ;;  %v2338_v57 = vld [vmem:[%s2681_s10 + $0x80] sm:$0xff] }
 0x26e   : > { %v2267_v10 = vpop.eup %2266  ;;  %1826 = vst [vmem:[%s2992_s25 + $0x20] sm:$0xff] %v1766_v60   ;;  %v1248_v48 = vmul.f32 %v2265_v26, %v2950_v22  ;;  %2292 = vpow2.f32 %v1664_v21  ;;  %v1277_v28 = vadd.f32 %v2334_v34, %v1245_v4 }
 0x26f   : > { %v2269_v9 = vpop.eup %2268  ;;  %2294 = vrcp.f32 %v1157_v33  ;;  %v1160_v15 = vadd.f32 1.0, %v2267_v10  ;;  %v1665_v5 = vmul.f32 -1.442695, %v3054_v7 }
 0x270   : > { %v2271_v16 = vpop.eup %2270  ;;  %v1280_v35 = vadd.f32 %v2333_v20, %v1248_v48  ;;  %v1246_v13 = vmul.f32 %v2269_v9, %v2954_v23  ;;  %2296 = vpow2.f32 %v1667_v47 }
 0x271   : > { %v2273_v25 = vpop.eup %2272  ;;  %2298 = vrcp.f32 %v1160_v15  ;;  %v1251_v51 = vmul.f32 %v2271_v16, %v2958_v59 }
 0x272   : > { %v2275_v22 = vpop.eup %2274  ;;  %v1781_v11 = vpack.c.bf16 %v1280_v35, %v1279_v19  ;;  %v1278_v39 = vadd.f32 %v2335_v43, %v1246_v13  ;;  %v1158_v30 = vadd.f32 1.0, %v2273_v25  ;;  %2300 = vpow2.f32 %v1665_v5  ;;  %v2340_v19 = vld [vmem:[%s2681_s10 + $0xb0] sm:$0xff]  ;;  %v2341_v35 = vld [vmem:[%s2681_s10 + $0xb8] sm:$0xff] }
 0x273   : > { %v2277_v52 = vpop.eup %2276  ;;  %v1249_v61 = vmul.f32 %v2275_v22, %v2962_v56  ;;  %v1283_v59 = vadd.f32 %v2336_v55, %v1251_v51 }
 0x274   : > { %v2279_v14 = vpop.eup %2278  ;;  %1829 = vst [vmem:[%s2992_s25 + $0x38] sm:$0xff] %v1781_v11   ;;  %v1776_v17 = vpack.c.bf16 %v1278_v39, %v1277_v28  ;;  %2302 = vrcp.f32 %v1158_v30  ;;  %v1163_v37 = vadd.f32 1.0, %v2277_v52  ;;  %v2342_v28 = vld [vmem:[%s2681_s10 + $0xa0] sm:$0xff] }
 0x275   : > { %v2281_v23 = vpop.eup %2280  ;;  %v1161_v12 = vadd.f32 1.0, %v2279_v14 }
 0x276   : > { %v2283_v58 = vpop.eup %2282  ;;  %1828 = vst [vmem:[%s2992_s25 + $0x30] sm:$0xff] %v1776_v17   ;;  %2304 = vrcp.f32 %v1163_v37  ;;  %v1164_v42 = vadd.f32 1.0, %v2281_v23  ;;  %v2344_v17 = vld [vmem:[%s2681_s10 + $0xd0] sm:$0xff]  ;;  %v2345_v23 = vld [vmem:[%s2681_s10 + $0xd8] sm:$0xff] }
 0x277   : > { %v2285_v44 = vpop.eup %2284  ;;  %v1252_v8 = vmul.f32 %v2283_v58, %v2968_v53  ;;  %2306 = vrcp.f32 %v1161_v12  ;;  %v1281_v53 = vadd.f32 %v2338_v57, %v1249_v61  ;;  %v2346_v58 = vld [vmem:[%s2681_s10 + $0xc0] sm:$0xff]  ;;  %v2347_v61 = vld [vmem:[%s2681_s10 + $0xc8] sm:$0xff] }
 0x278   : > { %v2287_v49 = vpop.eup %2286  ;;  %2308 = vrcp.f32 %v1164_v42  ;;  %v1162_v50 = vadd.f32 1.0, %v2285_v44 }
 0x279   : > { %v2289_v54 = vpop.eup %2288  ;;  %v1284_v45 = vadd.f32 %v2337_v32, %v1252_v8  ;;  %v1250_v3 = vmul.f32 %v2287_v49, %v2973_v2 }
 0x27a   : > { %v2291_v36 = vpop.eup %2290  ;;  %2310 = vrcp.f32 %v1162_v50  ;;  %v1167_v21 = vadd.f32 1.0, %v2289_v54 }
 0x27b   : > { %v2293_v56 = vpop.eup %2292  ;;  %v1791_v60 = vpack.c.bf16 %v1284_v45, %v1283_v59  ;;  %v1282_v4 = vadd.f32 %v2339_v63, %v1250_v3  ;;  %v1255_v2 = vmul.f32 %v2291_v36, %v2981_v31  ;;  %v2348_v59 = vld [vmem:[%s2681_s10 + $0xf0] sm:$0xff]  ;;  %v2349_v45 = vld [vmem:[%s2681_s10 + $0xf8] sm:$0xff] }
 0x27c   : > { %v2295_v1 = vpop.eup %2294  ;;  %2312 = vrcp.f32 %v1167_v21  ;;  %v1165_v26 = vadd.f32 1.0, %v2293_v56  ;;  %v2350_v21 = vld [vmem:[%s2681_s10 + $0xe0] sm:$0xff] }
 0x27d   : > { %v2297_v33 = vpop.eup %2296  ;;  %1831 = vst [vmem:[%s2992_s25 + $0x48] sm:$0xff] %v1791_v60   ;;  %v1786_v47 = vpack.c.bf16 %v1282_v4, %v1281_v53  ;;  %v1253_v5 = vmul.f32 %v2295_v1, %v2988_v27  ;;  %v1287_v20 = vadd.f32 %v2340_v19, %v1255_v2  ;;  %v2343_v27 = vld [vmem:[%s2681_s10 + $0xa8] sm:$0xff] }
 0x27e   : > { %v2299_v10 = vpop.eup %2298  ;;  %2314 = vrcp.f32 %v1165_v26  ;;  %v1168_v48 = vadd.f32 1.0, %v2297_v33 }
 0x27f   : > { %v2301_v9 = vpop.eup %2300  ;;  %1830 = vst [vmem:[%s2992_s25 + $0x40] sm:$0xff] %v1786_v47   ;;  %v1256_v15 = vmul.f32 %v2299_v10, %v2998_v0  ;;  %v1285_v22 = vadd.f32 %v2342_v28, %v1253_v5 }
 0x280   : > { %2316 = vrcp.f32 %v1168_v48  ;;  %v1166_v16 = vadd.f32 1.0, %v2301_v9 }
 0x281   : > { %v2303_v38 = vpop.eup %2302  ;;  %v1288_v13 = vadd.f32 %v2341_v35, %v1256_v15 }
 0x282   : > { %v1254_v31 = vmul.f32 %v2303_v38, %v3003_v40  ;;  %2318 = vrcp.f32 %v1166_v16 }
 0x283   : > { %v2305_v25 = vpop.eup %2304  ;;  %v1801_v34 = vpack.c.bf16 %v1288_v13, %v1287_v20 }
 0x284   : > { %v2307_v0 = vpop.eup %2306  ;;  %v1286_v11 = vadd.f32 %v2343_v27, %v1254_v31  ;;  %v1259_v43 = vmul.f32 %v2305_v25, %v3012_v18 }
 0x285   : > { %v2309_v39 = vpop.eup %2308  ;;  %1833 = vst [vmem:[%s2992_s25 + $0x58] sm:$0xff] %v1801_v34   ;;  %v1257_v40 = vmul.f32 %v2307_v0, %v3017_v41 }
 0x286   : > { %v1796_v30 = vpack.c.bf16 %v1286_v11, %v1285_v22  ;;  %v1260_v52 = vmul.f32 %v2309_v39, %v3021_v62  ;;  %v1291_v37 = vadd.f32 %v2344_v17, %v1259_v43 }
 0x287   : > { %v2311_v14 = vpop.eup %2310  ;;  %v1289_v42 = vadd.f32 %v2346_v58, %v1257_v40 }
 0x288   : > { %1832 = vst [vmem:[%s2992_s25 + $0x50] sm:$0xff] %v1796_v30   ;;  %v1292_v51 = vadd.f32 %v2345_v23, %v1260_v52  ;;  %v1258_v12 = vmul.f32 %v2311_v14, %v3028_v24 }
 0x289   : > { %v2313_v18 = vpop.eup %2312 }
 0x28a   : > { %v1811_v44 = vpack.c.bf16 %v1292_v51, %v1291_v37  ;;  %v1290_v41 = vadd.f32 %v2347_v61, %v1258_v12  ;;  %v1263_v49 = vmul.f32 %v2313_v18, %v3034_v6  ;;  %v2351_v6 = vld [vmem:[%s2681_s10 + $0xe8] sm:$0xff] }
 0x28b   : > { %v2315_v8 = vpop.eup %2314 }
 0x28c   : > { %1835 = vst [vmem:[%s2992_s25 + $0x68] sm:$0xff] %v1811_v44   ;;  %v1806_v62 = vpack.c.bf16 %v1290_v41, %v1289_v42  ;;  %v1261_v24 = vmul.f32 %v2315_v8, %v3041_v46  ;;  %v1295_v32 = vadd.f32 %v2348_v59, %v1263_v49 }
 0x28d   : > { %v2317_v50 = vpop.eup %2316 }
 0x28e   : > { %1834 = vst [vmem:[%s2992_s25 + $0x60] sm:$0xff] %v1806_v62   ;;  %v1264_v54 = vmul.f32 %v2317_v50, %v3047_v29  ;;  %v1293_v56 = vadd.f32 %v2350_v21, %v1261_v24 }
 0x28f   : > { %v2319_v55 = vpop.eup %2318 }
 0x290   : > { %v1296_v3 = vadd.f32 %v2349_v45, %v1264_v54  ;;  %v1262_v36 = vmul.f32 %v2319_v55, %v3054_v7 }
 0x292   : > { %v1821_v57 = vpack.c.bf16 %v1296_v3, %v1295_v32  ;;  %v1294_v53 = vadd.f32 %v2351_v6, %v1262_v36  ;;  %1464 = sbr.rel (!%p3184_p0) target bundleno = 690 (0x2b2), region = 56 }
 0x294   : > { %1837 = vst [vmem:[%s2992_s25 + $0x78] sm:$0xff] %v1821_v57   ;;  %v1816_v60 = vpack.c.bf16 %v1294_v53, %v1293_v56 }
 0x296   : > { %1836 = vst [vmem:[%s2992_s25 + $0x70] sm:$0xff] %v1816_v60  }
 0x297   : > { %s3193_s14 = smov (!%p1467_p10, %s1466_s14), 32 }
 0x298   : > { %s3110_s15 = sshll.u32 %s3193_s14, 6 }
 0x299   : > { %s1471_s26 = ssub.s32 2048, %s3110_s15 }
 0x29a   : > { %1472 = vsyncadd %s1458_s12, %s1471_s26  ;;  %p1703_p1 = scmp.ne.s32.totalorder %s3110_s15, 0  ;;  %s1742_s30 = sshll.u32 %s2561_s22, 11 }
 0x29b   : > { %s3120_s13 = scalar_lea.hbm %s3172_s5, %s1742_s30  ;;  %s1477_s10 = sshll.u32 %s2992_s25, 4  ;;  %s3123_s10 = int_to_ptr.vmem [resolvable:$true] %s1477_s10 }
 0x29c   : > { %s2430_s29 = scalar_lea.vmem %s3123_s10, %s3110_s15  ;;  %s2507_s7 = smov [#allocation8]  }
 0x29d   : > { %p2431_p3 = scmp.ne.s32.totalorder %s3123_s10, %s2430_s29  ;;  %s2434_s16 = sshll.u32 %s2507_s7, 4  ;;  %s2435_s16 = int_to_ptr.vmem [resolvable:$false] %s2434_s16 }
 0x29e   : > { %s2436_s22 = scalar_lea.vmem %s2435_s16, 4096  ;;  %p2437_p12 = scmp.lt.s32.totalorder %s3123_s10, %s2435_s16 }
 0x29f   : > { %p2432_p7 = pnand %p2431_p3, %p1703_p1  ;;  %p2438_p8 = scmp.lt.s32.totalorder %s2436_s22, %s2430_s29 }
 0x2a1   : > { %p2433_p9 = pneg %p2432_p7  ;;  %p2439_p4 = por %p2438_p8, %p2437_p12 }
 0x2a3   : > { %p2440_p6 = pnand %p2439_p4, %p2433_p9 }
 0x2a5   : > { %2443 = shalt.err (!%p2440_p6)
}
 0x2a6   : > { %s2444_s17 = scalar_lea.hbm %s3120_s13, %s3110_s15  ;;  %s2448_s28 = scalar_lea.hbm %s3172_s5, 8000 }
 0x2a7   : > { %p2445_p11 = scmp.ne.s32.totalorder %s3120_s13, %s2444_s17  ;;  %p2449_p13 = scmp.lt.s32.totalorder %s3120_s13, %s3172_s5 }
 0x2a8   : > { %p2450_p0 = scmp.lt.s32.totalorder %s2448_s28, %s2444_s17 }
 0x2a9   : > { %p2446_p2 = pnand %p2445_p11, %p1703_p1 }
 0x2aa   : > { %p2451_p10 = por %p2450_p0, %p2449_p13 }
 0x2ab   : > { %p2447_p5 = pneg %p2446_p2 }
 0x2ad   : > { %p2452_p3 = pnand %p2451_p10, %p2447_p5 }
 0x2af   : > { %2455 = shalt.err (!%p2452_p3)
}
 0x2b0   : > { %s2508_s30 = smov 64   ;;  %s2509_s8 = smov 4  }
 0x2b1   : > { %1483 = dma.vmem_to_hbm [thread:$0]  (%p1703_p1), %s3123_s10, %s3110_s15, %s3120_s13, %s1458_s12, %s2508_s30, %s2508_s30, %s2509_s8  }
 0x2b2 PF: > { %p2007_p7 = scmp.ge.s32.totalorder %s2498_s21, 2  ;;  %s1492_s11 = sand.u32 1, %s2486_s18  }
 0x2b3   : > { %p3185_p9 = scmp.ne.s32.totalorder %s3178_s6, 0  ;;  %s1493_s29 = scalar_lea.sflag [#allocation4], %s1492_s11 }
 0x2b5   : > { %p2000_p12 = pnand %p2007_p7, %p3185_p9 }
 0x2b7   : > { %p2001_p8 = pneg %p2000_p12 }
 0x2b9   : > { %2481 = dma.done.wait (%p2001_p8), %s1493_s29, 2048  }
 0x2ba   : > { %2483 = vsyncadd (%p2001_p8), %s1493_s29, 4294965248  ;;  %p19_p4 = scmp.ge.s32.totalorder %s2565_s24, 6   ;;  %s3186_s18 = smov %s2490_s19 }
 0x2bb   : > { %s3187_s19 = smov %s2494_s20  ;;  %s3188_s20 = smov %s2577_s27 }
 0x2bc   : > { %s3189_s21 = smov %s2565_s24  ;;  %21 = sbr.rel (!%p19_p4) target bundleno = 6 (0x6), region = 93 }
 0x2c1   :  { %1498 = vsyncpa [#allocation3], 1 }
 0x2c2   :  { %1500 = vsyncpa [#allocation3 + $0x1], 1 }
 0x2c3   :  { %1501 = vsyncpa [#allocation6], 1 }
 0x2c4   :  { %1502 = vsyncpa [#allocation4], 1 }
 0x2c5   :  { %1504 = vsyncpa [#allocation4 + $0x1], 1 }

</bundles_post_ra>
